<compile_context>
chip_gen: v7x
topology: tpu7x:2x2x1
jax: 0.10.0
libtpu: 0.0.40
codegen_flags: <defaults>
</compile_context>

<pallas_src>
import numpy as np
import jax
import jax.numpy as jnp
from jax.experimental import pallas as pl
from jax.experimental.pallas import tpu as pltpu

# ---------------- problem configuration (small, deterministic) ----------------
N           = 64        # number of nodes
INPUT_DIM   = 4
N_CHANNELS  = 8
N_HIDDEN    = 32
N_LAYERS    = 2         # kernel hardcodes the 2-layer (one hidden) MLP
THRESHOLD   = 0.5
RADIUS      = 0.5       # constructor arg (non-default to exercise the weight-folded radius path)
OUT_DIM     = INPUT_DIM + N_CHANNELS + 1          # 13
IDX_SCORE   = INPUT_DIM + N_CHANNELS              # 12
BN_EPS      = 1e-5
LEAKY_SLOPE = 0.01
LANES       = 128

# ---- packed data slab layout: one (N, 128) f32 array --------------------------
COL_INP  = 0                       # cols 0:4    inputs (lands directly under output pos cols)
COL_EMB  = 8                       # cols 8:16   embeddings

# ---- packed parameter slab layout: one (48, 128) f32 array --------------------
ROW_W1   = 0                       # rows 0:8,   cols 0:32   W1 (in, hidden)
ROW_G1   = 8                       # row 8,      cols 0:32   BN1 gamma
ROW_BE1  = 9                       # row 9,      cols 0:32   BN1 beta
ROW_B2   = 10                      # row 10,     cols 0:13   b2 (radius-folded, zero-padded)
ROW_SBN  = 11                      # row 11,     col 0 = score-BN gamma, col 1 = beta
ROW_W2   = 16                      # rows 16:48, cols 0:128  W2 (radius-folded, zero-padded)
PAR_ROWS = ROW_W2 + N_HIDDEN       # 48 (multiple of 8)


# --------------------------------- kernel -------------------------------------
def selection_kernel(data_ref, par_ref, out_ref):
    data = data_ref[...]                                            # (N, 128)
    emb  = data_ref[:, COL_EMB:COL_EMB + N_CHANNELS]                # (N, 8) static ref slice

    # static views into the packed parameter slab
    w1  = par_ref[ROW_W1:ROW_W1 + N_CHANNELS, 0:N_HIDDEN]           # (8, 32)
    g1  = par_ref[ROW_G1:ROW_G1 + 1, 0:N_HIDDEN]                    # (1, 32)
    be1 = par_ref[ROW_BE1:ROW_BE1 + 1, 0:N_HIDDEN]                  # (1, 32)
    b2  = par_ref[ROW_B2:ROW_B2 + 1, :]                             # (1, 128) radius-folded, 0-pad
    gs  = par_ref[ROW_SBN:ROW_SBN + 1, 0:1]                         # (1, 1)
    bs  = par_ref[ROW_SBN:ROW_SBN + 1, 1:2]                         # (1, 1)
    w2  = par_ref[ROW_W2:ROW_W2 + N_HIDDEN, :]                      # (32, 128) radius-folded, 0-pad

    # ---- layer 1: Linear (bias dropped; cancelled by BN) -> BN(batch) -> LeakyReLU ----
    h   = jnp.dot(emb, w1, preferred_element_type=jnp.float32)      # (N, 32)
    mu  = jnp.mean(h, axis=0, keepdims=True)
    hc  = h - mu                                                    # centered, reused
    var = jnp.mean(hc * hc, axis=0, keepdims=True)
    h   = hc * jax.lax.rsqrt(var + BN_EPS) * g1 + be1
    h   = jnp.where(h >= 0.0, h, LEAKY_SLOPE * h)

    # ---- layer 2: plain Linear, full lane-dense (N, 128) result ----
    # cols 0:4 already hold update * radius (radius folded into W2/b2 host-side).
    x = jnp.dot(h, w2, preferred_element_type=jnp.float32) + b2     # (N, 128)

    # ---- score_norm: BatchNorm(1) on column IDX_SCORE, then sigmoid ----
    s    = x[:, IDX_SCORE:IDX_SCORE + 1]                            # (N, 1)
    smu  = jnp.mean(s, axis=0, keepdims=True)
    scn  = s - smu
    svar = jnp.mean(scn * scn, axis=0, keepdims=True)
    score = jax.nn.sigmoid(scn * jax.lax.rsqrt(svar + BN_EPS) * gs + bs)   # (N, 1)

    # ---- assemble single lane-dense output slab ----
    # cols 0:4   = inputs + update * radius   (plain add: inputs sit in data cols 0:4)
    # cols 4:12  = objects
    # col  12    = score
    # cols 13:   = zero padding (zero-padded W2 / b2, masked data slab)
    col  = jax.lax.broadcasted_iota(jnp.int32, (N, LANES), 1)
    base = jnp.where(col < INPUT_DIM, data, 0.0)                    # keep only the input columns
    out  = x + base
    out_ref[...] = jnp.where(col == IDX_SCORE, score, out)


def _vmem_spec():
    return pl.BlockSpec(memory_space=pltpu.MemorySpace.VMEM)


# ------------------------------ host-side packing ------------------------------
def pack_params(w1, b1, g1, be1, w2, b2, gs, bs, radius):
    """Pack all parameters into one (48, 128) f32 slab.  b1 is intentionally omitted
    (exactly cancelled by the batch-statistics BatchNorm); radius is folded into the
    first INPUT_DIM output columns of W2 / b2."""
    del b1
    scale = jnp.ones((OUT_DIM,), jnp.float32).at[:INPUT_DIM].set(radius)
    w2s = w2 * scale[None, :]
    b2s = b2.reshape(-1) * scale
    par = jnp.zeros((PAR_ROWS, LANES), jnp.float32)
    par = par.at[ROW_W1:ROW_W1 + N_CHANNELS, 0:N_HIDDEN].set(w1)
    par = par.at[ROW_G1, 0:N_HIDDEN].set(g1.reshape(-1))
    par = par.at[ROW_BE1, 0:N_HIDDEN].set(be1.reshape(-1))
    par = par.at[ROW_B2, 0:OUT_DIM].set(b2s)
    par = par.at[ROW_SBN, 0].set(gs.reshape(()))
    par = par.at[ROW_SBN, 1].set(bs.reshape(()))
    par = par.at[ROW_W2:ROW_W2 + N_HIDDEN, 0:OUT_DIM].set(w2s)
    return par


def pack_data(inputs, embeddings):
    """Pack (N, input_dim) inputs and (N, n_channels) embeddings into one lane-dense
    (N, 128) data slab (inputs in cols 0:4, embeddings in cols 8:16)."""
    d = jnp.zeros((N, LANES), jnp.float32)
    d = d.at[:, COL_INP:COL_INP + INPUT_DIM].set(inputs)
    d = d.at[:, COL_EMB:COL_EMB + N_CHANNELS].set(embeddings)
    return d


@jax.jit
def selection_mechanism_pallas(inputs, embeddings, par):
    """Runs the fused kernel.  Returns (objects_full, pos_full, score) as slices of a
    single lane-dense (N, 128) output slab."""
    data = pack_data(inputs, embeddings)
    fn = pl.pallas_call(
        selection_kernel,
        out_shape=jax.ShapeDtypeStruct((N, LANES), jnp.float32),
        in_specs=[_vmem_spec(), _vmem_spec()],
        out_specs=_vmem_spec(),
    )
    out = fn(data, par)
    pos     = out[:, :INPUT_DIM]
    objects = out[:, INPUT_DIM:INPUT_DIM + N_CHANNELS]
    score   = out[:, IDX_SCORE]
    return objects, pos, score


# ----------------------------- pure-JAX reference ------------------------------
def selection_reference(inputs, embeddings, params):
    w1, b1, g1, be1, w2, b2, gs, bs = params
    h = embeddings @ w1 + b1                       # b1 included here -> verifies BN cancellation
    mu = h.mean(0, keepdims=True)
    var = ((h - mu) ** 2).mean(0, keepdims=True)
    h = (h - mu) / jnp.sqrt(var + BN_EPS) * g1 + be1
    h = jnp.where(h >= 0, h, LEAKY_SLOPE * h)
    x = h @ w2 + b2
    update = x[:, :INPUT_DIM]
    objects = x[:, INPUT_DIM:INPUT_DIM + N_CHANNELS]
    s = x[:, -1:]
    smu = s.mean(0, keepdims=True)
    svar = ((s - smu) ** 2).mean(0, keepdims=True)
    s = (s - smu) / jnp.sqrt(svar + BN_EPS) * gs + bs
    score = jax.nn.sigmoid(s)[:, 0]
    pos = inputs + update * RADIUS
    mask = (score > THRESHOLD)
    return objects, pos, score, mask


# ----------------------------------- main --------------------------------------
if __name__ == "__main__":
    key = jax.random.PRNGKey(0)
    k_in, k_emb, k_w1, k_b1, k_w2, k_b2 = jax.random.split(key, 6)

    inputs     = jax.random.normal(k_in,  (N, INPUT_DIM),  dtype=jnp.float32)
    embeddings = jax.random.normal(k_emb, (N, N_CHANNELS), dtype=jnp.float32)

    # deterministic parameter init (Linear weights stored pre-transposed: (in, out))
    w1 = jax.random.normal(k_w1, (N_CHANNELS, N_HIDDEN), dtype=jnp.float32) * 0.2
    b1 = jax.random.normal(k_b1, (1, N_HIDDEN), dtype=jnp.float32) * 0.1
    w2 = jax.random.normal(k_w2, (N_HIDDEN, OUT_DIM), dtype=jnp.float32) * 0.2
    b2 = jax.random.normal(k_b2, (1, OUT_DIM), dtype=jnp.float32) * 0.1
    # BatchNorm affine params at their PyTorch defaults (weight=1, bias=0)
    g1  = jnp.ones((1, N_HIDDEN), dtype=jnp.float32)
    be1 = jnp.zeros((1, N_HIDDEN), dtype=jnp.float32)
    gs  = jnp.ones((1, 1), dtype=jnp.float32)
    bs  = jnp.zeros((1, 1), dtype=jnp.float32)
    params = (w1, b1, g1, be1, w2, b2, gs, bs)

    par = pack_params(*params, RADIUS)             # packed once (model parameters)
    obj_full, pos_full, score = jax.block_until_ready(
        selection_mechanism_pallas(inputs, embeddings, par))

    # reference check (reference keeps b1 / unscaled W2,b2 -> verifies BN cancellation
    # and the radius weight-folding numerically)
    r_obj, r_pos, r_score, r_mask = selection_reference(inputs, embeddings, params)
    np.testing.assert_allclose(np.asarray(obj_full), np.asarray(r_obj), rtol=1e-4, atol=1e-4)
    np.testing.assert_allclose(np.asarray(pos_full), np.asarray(r_pos), rtol=1e-4, atol=1e-4)
    np.testing.assert_allclose(np.asarray(score),    np.asarray(r_score), rtol=1e-4, atol=1e-4)

    # threshold + data-dependent boolean gather (variable output size) done host-side,
    # matching `objects[mask, :]` / `inputs[mask, :] + update[mask, :] * radius`.
    mask = np.asarray(score) > THRESHOLD
    np.testing.assert_array_equal(mask, np.asarray(r_mask))
    objects     = np.asarray(obj_full)[mask]
    objects_pos = np.asarray(pos_full)[mask]
    assert objects.shape[1] == N_CHANNELS and objects_pos.shape[1] == INPUT_DIM

    print("KERNEL_OK")
</pallas_src>

<mosaic_0001>
module attributes {stable_mosaic.version = 11 : i64} {
  func.func @selection_kernel(%arg0: memref<64x128xf32, #tpu.memory_space<vmem>>, %arg1: memref<48x128xf32, #tpu.memory_space<vmem>>, %arg2: memref<64x128xf32, #tpu.memory_space<vmem>>) attributes {dimension_semantics = [], scalar_prefetch = 0 : i64, scratch_operands = 0 : i64, tpu.core_type = #tpu.core_type<tc>} {
    %c0 = arith.constant 0 : index
    %c0_0 = arith.constant 0 : index
    %0 = vector.load %arg0[%c0, %c0_0] : memref<64x128xf32, #tpu.memory_space<vmem>>, vector<64x128xf32>
    %c0_1 = arith.constant 0 : index
    %c8 = arith.constant 8 : index
    %1 = vector.load %arg0[%c0_1, %c8] : memref<64x128xf32, #tpu.memory_space<vmem>>, vector<64x8xf32>
    %c0_2 = arith.constant 0 : index
    %c0_3 = arith.constant 0 : index
    %2 = vector.load %arg1[%c0_2, %c0_3] : memref<48x128xf32, #tpu.memory_space<vmem>>, vector<8x32xf32>
    %c8_4 = arith.constant 8 : index
    %c0_5 = arith.constant 0 : index
    %3 = vector.load %arg1[%c8_4, %c0_5] : memref<48x128xf32, #tpu.memory_space<vmem>>, vector<1x32xf32>
    %c9 = arith.constant 9 : index
    %c0_6 = arith.constant 0 : index
    %4 = vector.load %arg1[%c9, %c0_6] : memref<48x128xf32, #tpu.memory_space<vmem>>, vector<1x32xf32>
    %c10 = arith.constant 10 : index
    %c0_7 = arith.constant 0 : index
    %5 = vector.load %arg1[%c10, %c0_7] : memref<48x128xf32, #tpu.memory_space<vmem>>, vector<1x128xf32>
    %c11 = arith.constant 11 : index
    %c0_8 = arith.constant 0 : index
    %6 = vector.load %arg1[%c11, %c0_8] : memref<48x128xf32, #tpu.memory_space<vmem>>, vector<1x1xf32>
    %c11_9 = arith.constant 11 : index
    %c1 = arith.constant 1 : index
    %7 = vector.load %arg1[%c11_9, %c1] : memref<48x128xf32, #tpu.memory_space<vmem>>, vector<1x1xf32>
    %c16 = arith.constant 16 : index
    %c0_10 = arith.constant 0 : index
    %8 = vector.load %arg1[%c16, %c0_10] : memref<48x128xf32, #tpu.memory_space<vmem>>, vector<32x128xf32>
    %cst = arith.constant dense<0.000000e+00> : vector<64x32xf32>
    %9 = tpu.matmul %1, %2, %cst {dimension_numbers = #tpu.dot_dimension_numbers<[1], [0], [0], [1], [0, 0, 1, 1], [], []>} : vector<64x8xf32>, vector<8x32xf32>, vector<64x32xf32> -> vector<64x32xf32>
    %cst_11 = arith.constant dense<0.000000e+00> : vector<32xf32>
    %10 = vector.multi_reduction <add>, %9, %cst_11 [0] : vector<64x32xf32> to vector<32xf32>
    %11 = vector.shape_cast %10 : vector<32xf32> to vector<1x32xf32>
    %cst_12 = arith.constant 6.400000e+01 : f32
    %12 = vector.broadcast %cst_12 : f32 to vector<1x32xf32>
    %13 = arith.divf %11, %12 : vector<1x32xf32>
    %14 = vector.broadcast %13 : vector<1x32xf32> to vector<64x32xf32>
    %15 = arith.subf %9, %14 : vector<64x32xf32>
    %16 = arith.mulf %15, %15 : vector<64x32xf32>
    %cst_13 = arith.constant dense<0.000000e+00> : vector<32xf32>
    %17 = vector.multi_reduction <add>, %16, %cst_13 [0] : vector<64x32xf32> to vector<32xf32>
    %18 = vector.shape_cast %17 : vector<32xf32> to vector<1x32xf32>
    %cst_14 = arith.constant 6.400000e+01 : f32
    %19 = vector.broadcast %cst_14 : f32 to vector<1x32xf32>
    %20 = arith.divf %18, %19 : vector<1x32xf32>
    %cst_15 = arith.constant 9.99999974E-6 : f32
    %21 = vector.broadcast %cst_15 : f32 to vector<1x32xf32>
    %22 = arith.addf %20, %21 : vector<1x32xf32>
    %23 = math.rsqrt %22 : vector<1x32xf32>
    %24 = vector.broadcast %23 : vector<1x32xf32> to vector<64x32xf32>
    %25 = arith.mulf %15, %24 : vector<64x32xf32>
    %26 = vector.broadcast %3 : vector<1x32xf32> to vector<64x32xf32>
    %27 = arith.mulf %25, %26 : vector<64x32xf32>
    %28 = vector.broadcast %4 : vector<1x32xf32> to vector<64x32xf32>
    %29 = arith.addf %27, %28 : vector<64x32xf32>
    %cst_16 = arith.constant 0.000000e+00 : f32
    %30 = vector.broadcast %cst_16 : f32 to vector<64x32xf32>
    %31 = arith.cmpf oge, %29, %30 : vector<64x32xf32>
    %cst_17 = arith.constant 0.00999999977 : f32
    %32 = vector.broadcast %cst_17 : f32 to vector<64x32xf32>
    %33 = arith.mulf %32, %29 : vector<64x32xf32>
    %34 = arith.select %31, %29, %33 : vector<64x32xi1>, vector<64x32xf32>
    %cst_18 = arith.constant dense<0.000000e+00> : vector<64x128xf32>
    %35 = tpu.matmul %34, %8, %cst_18 {dimension_numbers = #tpu.dot_dimension_numbers<[1], [0], [0], [1], [0, 0, 1, 1], [], []>} : vector<64x32xf32>, vector<32x128xf32>, vector<64x128xf32> -> vector<64x128xf32>
    %36 = vector.broadcast %5 : vector<1x128xf32> to vector<64x128xf32>
    %37 = arith.addf %35, %36 : vector<64x128xf32>
    %38 = vector.extract_strided_slice %37 {offsets = [0, 12], sizes = [64, 1], strides = [1, 1]} : vector<64x128xf32> to vector<64x1xf32>
    %cst_19 = arith.constant dense<0.000000e+00> : vector<1xf32>
    %39 = vector.multi_reduction <add>, %38, %cst_19 [0] : vector<64x1xf32> to vector<1xf32>
    %40 = vector.shape_cast %39 : vector<1xf32> to vector<1x1xf32>
    %cst_20 = arith.constant 6.400000e+01 : f32
    %41 = vector.broadcast %cst_20 : f32 to vector<1x1xf32>
    %42 = arith.divf %40, %41 : vector<1x1xf32>
    %43 = vector.broadcast %42 : vector<1x1xf32> to vector<64x1xf32>
    %44 = arith.subf %38, %43 : vector<64x1xf32>
    %45 = arith.mulf %44, %44 : vector<64x1xf32>
    %cst_21 = arith.constant dense<0.000000e+00> : vector<1xf32>
    %46 = vector.multi_reduction <add>, %45, %cst_21 [0] : vector<64x1xf32> to vector<1xf32>
    %47 = vector.shape_cast %46 : vector<1xf32> to vector<1x1xf32>
    %cst_22 = arith.constant 6.400000e+01 : f32
    %48 = vector.broadcast %cst_22 : f32 to vector<1x1xf32>
    %49 = arith.divf %47, %48 : vector<1x1xf32>
    %cst_23 = arith.constant 9.99999974E-6 : f32
    %50 = vector.broadcast %cst_23 : f32 to vector<1x1xf32>
    %51 = arith.addf %49, %50 : vector<1x1xf32>
    %52 = math.rsqrt %51 : vector<1x1xf32>
    %53 = vector.broadcast %52 : vector<1x1xf32> to vector<64x1xf32>
    %54 = arith.mulf %44, %53 : vector<64x1xf32>
    %55 = vector.broadcast %6 : vector<1x1xf32> to vector<64x1xf32>
    %56 = arith.mulf %54, %55 : vector<64x1xf32>
    %57 = vector.broadcast %7 : vector<1x1xf32> to vector<64x1xf32>
    %58 = arith.addf %56, %57 : vector<64x1xf32>
    %59 = arith.negf %58 : vector<64x1xf32>
    %60 = math.exp %59 : vector<64x1xf32>
    %cst_24 = arith.constant 1.000000e+00 : f32
    %61 = vector.broadcast %cst_24 : f32 to vector<64x1xf32>
    %62 = arith.addf %61, %60 : vector<64x1xf32>
    %63 = arith.divf %61, %62 : vector<64x1xf32>
    %64 = tpu.iota {dimensions = array<i32: 1>} : vector<64x128xi32>
    %c4_i32 = arith.constant 4 : i32
    %65 = vector.broadcast %c4_i32 : i32 to vector<64x128xi32>
    %66 = arith.cmpi slt, %64, %65 : vector<64x128xi32>
    %cst_25 = arith.constant 0.000000e+00 : f32
    %67 = vector.broadcast %cst_25 : f32 to vector<64x128xf32>
    %68 = arith.select %66, %0, %67 : vector<64x128xi1>, vector<64x128xf32>
    %69 = arith.addf %37, %68 : vector<64x128xf32>
    %c12_i32 = arith.constant 12 : i32
    %70 = vector.broadcast %c12_i32 : i32 to vector<64x128xi32>
    %71 = arith.cmpi eq, %64, %70 : vector<64x128xi32>
    %72 = vector.shape_cast %63 : vector<64x1xf32> to vector<64x1xf32>
    %73 = vector.broadcast %72 : vector<64x1xf32> to vector<64x128xf32>
    %74 = arith.select %71, %73, %69 : vector<64x128xi1>, vector<64x128xf32>
    %c0_26 = arith.constant 0 : index
    %c0_27 = arith.constant 0 : index
    %75 = vector.load %arg2[%c0_26, %c0_27] : memref<64x128xf32, #tpu.memory_space<vmem>>, vector<64x128xf32>
    tpu.vector_store %arg2[%c0_26, %c0_27], %74 {strides = array<i32>} : memref<64x128xf32, #tpu.memory_space<vmem>>, vector<64x128xf32>,
    return
  }
}

</mosaic_0001>

<bundles_post_ra>
// kernel: selection_mechanism_pallas.1
= control target key start
LH: loop header
LB: loop body
LE: loop exit
PB: predicated region body
PF: predicated region fallthrough
CT: control target
= control target key end

     0   :  { %s786_s13 = smov 120   ;;  %vm52_vm0 = vcmask 64512   ;;  %s787_s9 = smov 12   ;;  %vm174_vm1 = vcmask 261120   ;;  %vm427_vm11 = vcmask 105568   ;;  %s1020_s0 = inlined_call_operand.vmem [shape: f32[64,128], index: 0, kind: input, shape index: {}]   ;;  %s1021_s1 = inlined_call_operand.vmem [shape: f32[48,128], index: 1, kind: input, shape index: {}]   ;;  %s1022_s2 = inlined_call_operand.vmem [shape: f32[64,128], index: 2, kind: output, shape index: {}]  }
   0x1   :  { %v808_v0 = vld [vmem:[%s1020_s0] sm:$0xff]  ;;  %v813_v1 = vld [vmem:[%s1020_s0 + $0x10] sm:$0xff]  ;;  %v820_v2 = vld [vmem:[%s1020_s0 + $0x8] sm:$0xff]  ;;  %s788_s10 = smov 11  }
   0x2   :  { %36 = vrot.lane.b32.xlu0 %v808_v0, %s786_s13  ;;  %40 = vrot.lane.b32.xlu1 %v813_v1, %s786_s13  ;;  %v825_v3 = vld [vmem:[%s1020_s0 + $0x18] sm:$0xff]  ;;  %v19_v4 = vld [vmem:[%s1021_s1] sm:$0xff] }
   0x3   :  { %702 = vmatprep.subr.mxu0 %v19_v4  ;;  %v835_v5 = vld [vmem:[%s1020_s0 + $0x20] sm:$0xff]  ;;  %v840_v6 = vld [vmem:[%s1020_s0 + $0x28] sm:$0xff]  ;;  %v847_v7 = vld [vmem:[%s1020_s0 + $0x30] sm:$0xff] }
   0x4   :  { %703 = vmatpush3.msra.mxu0 %v19_v4  ;;  %v852_v8 = vld [vmem:[%s1020_s0 + $0x38] sm:$0xff]  ;;  %v24_v17 = vld [vmem:[%s1021_s1 + $0x10] sm:$0xff]  ;;  %v26_v20 = vld [vmem:[%s1021_s1 + $0x20] sm:$0xff] }
   0x5   :  { %v25_v18 = vld [vmem:[%s1021_s1 + $0x18] sm:$0xff]  ;;  %v27_v21 = vld [vmem:[%s1021_s1 + $0x28] sm:$0xff] }
   0x6   :  { %38 = vrot.lane.b32.xlu0 %v820_v2, %s786_s13  ;;  %42 = vrot.lane.b32.xlu1 %v825_v3, %s786_s13  ;;  %v736_v19 = vpack.c.bf16 %v25_v18, %v24_v17  ;;  %v740_v22 = vpack.c.bf16 %v27_v21, %v26_v20  ;;  %v672_v23 = vld [vmem:[%s1021_s1 + $0xb] ss:$0 sm:$0xff] }
   0x8   :  { %737 = vmatprep.subr.bf16.mxu1 %v736_v19 }
   0x9   :  { %739 = vmatpush3.bf16.msra.mxu1 %v736_v19 }
   0xa   :  { %44 = vrot.lane.b32.xlu0 %v835_v5, %s786_s13  ;;  %46 = vrot.lane.b32.xlu1 %v840_v6, %s786_s13 }
   0xb   :  { %741 = vmatprep.subr.bf16.mxu1 %v740_v22 }
   0xd   :  { %743 = vmatpush3.bf16.msra.mxu1 %v740_v22 }
   0xe   :  { %48 = vrot.lane.b32.xlu0 %v847_v7, %s786_s13  ;;  %50 = vrot.lane.b32.xlu1 %v852_v8, %s786_s13 }
  0x12   :  { %503 = vrot.lane.b32.xlu0 %v672_v23, %s787_s9  ;;  %514 = vrot.lane.b32.xlu1 %v672_v23, %s788_s10 }
  0x74   :  { %v37_v9 = vpop.permute.xlu0 %36  ;;  %v41_v10 = vpop.permute.xlu1 %40 }
  0x75   :  { %704 = vmatprep.mubr.msk.f32.mxu0 %vm52_vm0, %v37_v9 }
  0x78   :  { %v39_v11 = vpop.permute.xlu0 %38  ;;  %v43_v12 = vpop.permute.xlu1 %42 }
  0x79   :  { %705 = vmatmul.mubr.msk.f32.vlgmr.msra.gmra.mrb[0].mxu0 %vm52_vm0, %v39_v11 }
  0x7a   :  { %707 = vmatprep.mubr.msk.f32.mxu0 %vm52_vm0, %v41_v10 }
  0x7c   :  { %v45_v13 = vpop.permute.xlu0 %44  ;;  %v47_v14 = vpop.permute.xlu1 %46 }
  0x7d   :  { %708 = vmatmul.mubr.msk.f32.gmra.mrb[2].mxu0 %vm52_vm0, %v43_v12 }
  0x7e   :  { %710 = vmatprep.mubr.msk.f32.mxu0 %vm52_vm0, %v45_v13 }
  0x80   :  { %v49_v15 = vpop.permute.xlu0 %48  ;;  %v51_v16 = vpop.permute.xlu1 %50 }
  0x81   :  { %711 = vmatmul.mubr.msk.f32.gmra.mrb[4].mxu0 %vm52_vm0, %v47_v14 }
  0x82   :  { %713 = vmatprep.mubr.msk.f32.mxu0 %vm52_vm0, %v49_v15 }
  0x85   :  { %714 = vmatmul.mubr.msk.f32.gmra.mrb[6].mxu0 %vm52_vm0, %v51_v16 }
 0x14c   :  { %v706_v24 = vpop.f32.mrb[0].mxu0 }
 0x14d   :  { %v176_v25 = vsel %vm174_vm1, %v706_v24, 0.0  ;;  %v135_v26 = vpop.f32.mrb[1].mxu0 }
 0x14e   :  { %v175_v27 = vsel %vm174_vm1, %v135_v26, 0.0 }
 0x14f   :  { %v177_v28 = vadd.f32 %v176_v25, %v175_v27 }
 0x150   :  { %v709_v29 = vpop.f32.mrb[2].mxu0 }
 0x151   :  { %v145_v30 = vpop.f32.mrb[3].mxu0  ;;  %v180_v33 = vsel %vm174_vm1, %v709_v29, 0.0 }
 0x152   :  { %v178_v31 = vsel %vm174_vm1, %v145_v30, 0.0 }
 0x153   :  { %v179_v32 = vadd.f32 %v178_v31, %v177_v28 }
 0x154   :  { %v712_v34 = vpop.f32.mrb[4].mxu0 }
 0x155   :  { %v155_v35 = vpop.f32.mrb[5].mxu0  ;;  %v181_v36 = vadd.f32 %v180_v33, %v179_v32  ;;  %v184_v39 = vsel %vm174_vm1, %v712_v34, 0.0 }
 0x156   :  { %v182_v37 = vsel %vm174_vm1, %v155_v35, 0.0 }
 0x157   :  { %v183_v38 = vadd.f32 %v182_v37, %v181_v36 }
 0x158   :  { %v715_v40 = vpop.f32.mrb[6].mxu0 }
 0x159   :  { %v165_v41 = vpop.f32.mrb[7].mxu0  ;;  %v185_v42 = vadd.f32 %v184_v39, %v183_v38  ;;  %v188_v45 = vsel %vm174_vm1, %v715_v40, 0.0  ;;  %v661_v38 = vld [vmem:[%s1021_s1 + $0x8] ss:$0 sm:$0xff] }
 0x15a   :  { %v186_v43 = vsel %vm174_vm1, %v165_v41, 0.0 }
 0x15b   :  { %v187_v44 = vadd.f32 %v186_v43, %v185_v42  ;;  %v662_v43 = vld [vmem:[%s1021_s1 + $0x9] ss:$0 sm:$0xff] }
 0x15d   :  { %v189_v46 = vadd.f32 %v188_v45, %v187_v44 }
 0x15f   :  { %v190_v47 = vrot.slane %v189_v46, 4 }
 0x161   :  { %v191_v48 = vadd.f32 %v190_v47, %v189_v46 }
 0x163   :  { %v192_v49 = vrot.slane %v191_v48, 2 }
 0x165   :  { %v193_v50 = vadd.f32 %v192_v49, %v191_v48 }
 0x167   :  { %v194_v51 = vrot.slane %v193_v50, 1 }
 0x169   :  { %v195_v52 = vadd.f32 %v194_v51, %v193_v50 }
 0x16b   :  { %v197_v53 = vmul.f32 0.015625, %v195_v52 }
 0x16d   :  { %v198_v54 = vsub.f32 %v135_v26, %v197_v53  ;;  %v199_v55 = vsub.f32 %v706_v24, %v197_v53  ;;  %v200_v56 = vsub.f32 %v145_v30, %v197_v53  ;;  %v201_v57 = vsub.f32 %v709_v29, %v197_v53 }
 0x16e   :  { %v202_v58 = vsub.f32 %v155_v35, %v197_v53  ;;  %v203_v59 = vsub.f32 %v712_v34, %v197_v53  ;;  %v204_v60 = vsub.f32 %v165_v41, %v197_v53  ;;  %v205_v61 = vsub.f32 %v715_v40, %v197_v53 }
 0x16f   :  { %v206_v62 = vmul.f32 %v198_v54, %v198_v54  ;;  %v207_v63 = vmul.f32 %v199_v55, %v199_v55  ;;  %v208_v4 = vmul.f32 %v200_v56, %v200_v56  ;;  %v209_v9 = vmul.f32 %v201_v57, %v201_v57 }
 0x170   :  { %v210_v13 = vmul.f32 %v202_v58, %v202_v58  ;;  %v211_v16 = vmul.f32 %v203_v59, %v203_v59  ;;  %v212_v19 = vmul.f32 %v204_v60, %v204_v60  ;;  %v213_v22 = vmul.f32 %v205_v61, %v205_v61 }
 0x171   :  { %v214_v10 = vsel %vm174_vm1, %v206_v62, 0.0  ;;  %v215_v11 = vsel %vm174_vm1, %v207_v63, 0.0  ;;  %v217_v14 = vsel %vm174_vm1, %v208_v4, 0.0  ;;  %v219_v17 = vsel %vm174_vm1, %v209_v9, 0.0 }
 0x172   :  { %v216_v12 = vadd.f32 %v215_v11, %v214_v10  ;;  %v221_v20 = vsel %vm174_vm1, %v210_v13, 0.0  ;;  %v223_v23 = vsel %vm174_vm1, %v211_v16, 0.0  ;;  %v225_v25 = vsel %vm174_vm1, %v212_v19, 0.0 }
 0x173   :  { %v227_v27 = vsel %vm174_vm1, %v213_v22, 0.0 }
 0x174   :  { %v218_v15 = vadd.f32 %v217_v14, %v216_v12 }
 0x176   :  { %v220_v18 = vadd.f32 %v219_v17, %v218_v15 }
 0x178   :  { %v222_v21 = vadd.f32 %v221_v20, %v220_v18 }
 0x17a   :  { %v224_v24 = vadd.f32 %v223_v23, %v222_v21 }
 0x17c   :  { %v226_v26 = vadd.f32 %v225_v25, %v224_v24  ;;  %v789_v24 = vmov 12   ;;  %v573_v25 = vlaneseq }
 0x17d   :  { %749 = vset.pattern.permute.xlu1 %v789_v24  ;;  %748 = vset.pattern.permute.xlu0 %v789_v24 }
 0x17e   :  { %v228_v28 = vadd.f32 %v227_v27, %v226_v26  ;;  %v909_v26 = vand.u32 127, %v573_v25  ;;  %v663_v27 = vld [vmem:[%s1021_s1 + $0xa] ss:$0 sm:$0xff] }
 0x180   :  { %v229_v29 = vrot.slane %v228_v28, 4  ;;  %vm575_vm10 = vcmp.lt.s32.totalorder %v909_v26, 4  ;;  %vm592_vm12 = vcmp.eq.s32.totalorder %v909_v26, 12 }
 0x182   :  { %v230_v30 = vadd.f32 %v229_v29, %v228_v28  ;;  %v577_v28 = vsel %vm575_vm10, %v820_v2, 0.0 }
 0x184   :  { %v231_v31 = vrot.slane %v230_v30, 2 }
 0x186   :  { %v232_v32 = vadd.f32 %v231_v31, %v230_v30  ;;  %v576_v30 = vsel %vm575_vm10, %v808_v0, 0.0  ;;  %v578_v0 = vsel %vm575_vm10, %v813_v1, 0.0 }
 0x188   :  { %v233_v33 = vrot.slane %v232_v32, 1 }
 0x18a   :  { %v234_v34 = vadd.f32 %v233_v33, %v232_v32 }
 0x18c   :  { %v235_v35 = vmul.f32 0.015625, %v234_v34 }
 0x18e   :  { %v236_v36 = vadd.f32 1e-05, %v235_v35 }
 0x190   :  { %750 = vrsqrt.f32 %v236_v36  ;;  %v579_v36 = vsel %vm575_vm10, %v825_v3, 0.0 }
 0x19a   :  { %v751_v37 = vpop.eup %750 }
 0x19b   :  { %v244_v39 = vmul.f32 %v751_v37, %v204_v60  ;;  %v238_v40 = vmul.f32 %v751_v37, %v198_v54  ;;  %v239_v41 = vmul.f32 %v751_v37, %v199_v55  ;;  %v240_v42 = vmul.f32 %v751_v37, %v200_v56 }
 0x19c   :  { %v241_v44 = vmul.f32 %v751_v37, %v201_v57  ;;  %v242_v45 = vmul.f32 %v751_v37, %v202_v58  ;;  %v243_v46 = vmul.f32 %v751_v37, %v203_v59  ;;  %v245_v47 = vmul.f32 %v751_v37, %v205_v61 }
 0x19d   :  { %v250_v48 = vmul.f32 %v661_v38, %v238_v40  ;;  %v251_v49 = vmul.f32 %v661_v38, %v239_v41  ;;  %v252_v50 = vmul.f32 %v661_v38, %v240_v42  ;;  %v256_v60 = vmul.f32 %v661_v38, %v244_v39 }
 0x19e   :  { %v253_v51 = vmul.f32 %v661_v38, %v241_v44  ;;  %v254_v52 = vmul.f32 %v661_v38, %v242_v45  ;;  %v255_v56 = vmul.f32 %v661_v38, %v243_v46  ;;  %v257_v11 = vmul.f32 %v661_v38, %v245_v47 }
 0x19f   :  { %v262_v53 = vadd.f32 %v662_v43, %v250_v48  ;;  %v263_v62 = vadd.f32 %v662_v43, %v251_v49  ;;  %v264_v63 = vadd.f32 %v662_v43, %v252_v50  ;;  %v268_v12 = vadd.f32 %v662_v43, %v256_v60 }
 0x1a0   :  { %v265_v54 = vadd.f32 %v662_v43, %v253_v51  ;;  %v266_v55 = vadd.f32 %v662_v43, %v254_v52  ;;  %v267_v10 = vadd.f32 %v662_v43, %v255_v56  ;;  %v269_v17 = vadd.f32 %v662_v43, %v257_v11 }
 0x1a1   :  { %vm270_vm2 = vcmp.ge.f32.partialorder %v262_v53, 0.0  ;;  %v278_v4 = vmul.f32 0.01, %v262_v53  ;;  %vm271_vm3 = vcmp.ge.f32.partialorder %v263_v62, 0.0  ;;  %v279_v9 = vmul.f32 0.01, %v263_v62 }
 0x1a2   :  { %vm272_vm4 = vcmp.ge.f32.partialorder %v264_v63, 0.0  ;;  %v280_v57 = vmul.f32 0.01, %v264_v63  ;;  %v281_v61 = vmul.f32 0.01, %v265_v54  ;;  %vm273_vm5 = vcmp.ge.f32.partialorder %v265_v54, 0.0 }
 0x1a3   :  { %v286_v58 = vsel %vm270_vm2, %v262_v53, %v278_v4  ;;  %v287_v59 = vsel %vm271_vm3, %v263_v62, %v279_v9  ;;  %v282_v14 = vmul.f32 0.01, %v266_v55  ;;  %vm274_vm6 = vcmp.ge.f32.partialorder %v266_v55, 0.0 }
 0x1a4   :  { %724 = vmatprep.mubr.msk.f32.mxu1 %vm174_vm1, %v286_v58  ;;  %v288_v13 = vsel %vm272_vm4, %v264_v63, %v280_v57  ;;  %v289_v15 = vsel %vm273_vm5, %v265_v54, %v281_v61  ;;  %v283_v16 = vmul.f32 0.01, %v267_v10  ;;  %vm275_vm7 = vcmp.ge.f32.partialorder %v267_v10, 0.0 }
 0x1a5   :  { %725 = vmatmul.mubr.msk.f32.vlgmr.msra.gmra.mrb[0].mxu1 %vm174_vm1, %v287_v59  ;;  %v290_v18 = vsel %vm274_vm6, %v266_v55, %v282_v14  ;;  %v284_v19 = vmul.f32 0.01, %v268_v12  ;;  %vm276_vm8 = vcmp.ge.f32.partialorder %v268_v12, 0.0  ;;  %v285_v21 = vmul.f32 0.01, %v269_v17 }
 0x1a6   :  { %727 = vmatprep.mubr.msk.f32.mxu1 %vm174_vm1, %v288_v13  ;;  %v291_v20 = vsel %vm275_vm7, %v267_v10, %v283_v16  ;;  %vm277_vm9 = vcmp.ge.f32.partialorder %v269_v17, 0.0  ;;  %v581_v44 = vsel %vm575_vm10, %v840_v6, 0.0  ;;  %v580_v47 = vsel %vm575_vm10, %v835_v5, 0.0 }
 0x1a7   :  { %v292_v22 = vsel %vm276_vm8, %v268_v12, %v284_v19  ;;  %v293_v23 = vsel %vm277_vm9, %v269_v17, %v285_v21  ;;  %v583_v6 = vsel %vm575_vm10, %v852_v8, 0.0  ;;  %v582_v5 = vsel %vm575_vm10, %v847_v7, 0.0 }
 0x1a9   :  { %728 = vmatmul.mubr.msk.f32.gmra.mrb[2].mxu1 %vm174_vm1, %v289_v15 }
 0x1aa   :  { %730 = vmatprep.mubr.msk.f32.mxu1 %vm174_vm1, %v290_v18 }
 0x1ad   :  { %731 = vmatmul.mubr.msk.f32.gmra.mrb[4].mxu1 %vm174_vm1, %v291_v20 }
 0x1ae   :  { %733 = vmatprep.mubr.msk.f32.mxu1 %vm174_vm1, %v292_v22 }
 0x1b1   :  { %734 = vmatmul.mubr.msk.f32.gmra.mrb[6].mxu1 %vm174_vm1, %v293_v23 }
 0x278   :  { %v726_v29 = vpop.f32.mrb[0].mxu1 }
 0x279   :  { %v394_v31 = vadd.f32 %v726_v29, %v663_v27  ;;  %v388_v32 = vpop.f32.mrb[1].mxu1 }
 0x27a   :  { %v389_v33 = vadd.f32 %v663_v27, %v388_v32 }
 0x27b   :  { %v429_v34 = vsel %vm427_vm11, %v394_v31, 0.0  ;;  %v922_v35 = vadd.f32 %v577_v28, %v394_v31 }
 0x27c   :  { %v428_v37 = vsel %vm427_vm11, %v389_v33, 0.0  ;;  %v928_v2 = vadd.f32 %v576_v30, %v389_v33  ;;  %v729_v38 = vpop.f32.mrb[2].mxu1 }
 0x27d   :  { %v430_v39 = vadd.f32 %v429_v34, %v428_v37  ;;  %v404_v40 = vadd.f32 %v729_v38, %v663_v27  ;;  %v398_v41 = vpop.f32.mrb[3].mxu1 }
 0x27e   :  { %v399_v42 = vadd.f32 %v663_v27, %v398_v41 }
 0x27f   :  { %v933_v43 = vadd.f32 %v579_v36, %v404_v40  ;;  %v433_v50 = vsel %vm427_vm11, %v404_v40, 0.0 }
 0x280   :  { %v431_v3 = vsel %vm427_vm11, %v399_v42, 0.0  ;;  %v939_v45 = vadd.f32 %v578_v0, %v399_v42  ;;  %v732_v46 = vpop.f32.mrb[4].mxu1 }
 0x281   :  { %v432_v1 = vadd.f32 %v431_v3, %v430_v39  ;;  %v414_v48 = vadd.f32 %v732_v46, %v663_v27  ;;  %v408_v49 = vpop.f32.mrb[5].mxu1 }
 0x282   :  { %v409_v51 = vadd.f32 %v663_v27, %v408_v49 }
 0x283   :  { %v945_v52 = vadd.f32 %v581_v44, %v414_v48  ;;  %v434_v53 = vadd.f32 %v433_v50, %v432_v1  ;;  %v437_v4 = vsel %vm427_vm11, %v414_v48, 0.0 }
 0x284   :  { %v435_v62 = vsel %vm427_vm11, %v409_v51, 0.0  ;;  %v951_v63 = vadd.f32 %v580_v47, %v409_v51  ;;  %v735_v60 = vpop.f32.mrb[6].mxu1 }
 0x285   :  { %v436_v54 = vadd.f32 %v435_v62, %v434_v53  ;;  %v424_v55 = vadd.f32 %v735_v60, %v663_v27  ;;  %v418_v56 = vpop.f32.mrb[7].mxu1 }
 0x286   :  { %v419_v9 = vadd.f32 %v663_v27, %v418_v56  ;;  %v504_v56 = vpop.permute.xlu0 %503 }
 0x287   :  { %v957_v57 = vadd.f32 %v583_v6, %v424_v55  ;;  %v438_v58 = vadd.f32 %v437_v4, %v436_v54  ;;  %v441_v10 = vsel %vm427_vm11, %v424_v55, 0.0 }
 0x288   :  { %v439_v8 = vsel %vm427_vm11, %v419_v9, 0.0  ;;  %v960_v59 = vadd.f32 %v582_v5, %v419_v9 }
 0x289   :  { %v440_v61 = vadd.f32 %v439_v8, %v438_v58 }
 0x28b   :  { %v442_v11 = vadd.f32 %v441_v10, %v440_v61 }
 0x28d   :  { %v443_v12 = vrot.slane %v442_v11, 4 }
 0x28f   :  { %v444_v13 = vadd.f32 %v443_v12, %v442_v11 }
 0x291   :  { %v445_v7 = vrot.slane %v444_v13, 2 }
 0x293   :  { %v446_v14 = vadd.f32 %v445_v7, %v444_v13  ;;  %v515_v13 = vpop.permute.xlu1 %514 }
 0x295   :  { %v447_v15 = vrot.slane %v446_v14, 1 }
 0x297   :  { %v448_v16 = vadd.f32 %v447_v15, %v446_v14 }
 0x299   :  { %v449_v17 = vmul.f32 0.015625, %v448_v16 }
 0x29b   :  { %v450_v18 = vsub.f32 %v389_v33, %v449_v17  ;;  %v451_v19 = vsub.f32 %v394_v31, %v449_v17  ;;  %v452_v20 = vsub.f32 %v399_v42, %v449_v17  ;;  %v453_v21 = vsub.f32 %v404_v40, %v449_v17 }
 0x29c   :  { %v454_v22 = vsub.f32 %v409_v51, %v449_v17  ;;  %v455_v23 = vsub.f32 %v414_v48, %v449_v17  ;;  %v456_v24 = vsub.f32 %v419_v9, %v449_v17  ;;  %v457_v25 = vsub.f32 %v424_v55, %v449_v17 }
 0x29d   :  { %v458_v27 = vmul.f32 %v450_v18, %v450_v18  ;;  %v459_v28 = vmul.f32 %v451_v19, %v451_v19  ;;  %v460_v29 = vmul.f32 %v452_v20, %v452_v20  ;;  %v461_v30 = vmul.f32 %v453_v21, %v453_v21 }
 0x29e   :  { %v462_v37 = vmul.f32 %v454_v22, %v454_v22  ;;  %v463_v31 = vmul.f32 %v455_v23, %v455_v23  ;;  %v464_v40 = vmul.f32 %v456_v24, %v456_v24  ;;  %v465_v44 = vmul.f32 %v457_v25, %v457_v25 }
 0x29f   :  { %v466_v32 = vsel %vm427_vm11, %v458_v27, 0.0  ;;  %v467_v34 = vsel %vm427_vm11, %v459_v28, 0.0  ;;  %v469_v38 = vsel %vm427_vm11, %v460_v29, 0.0  ;;  %v471_v0 = vsel %vm427_vm11, %v461_v30, 0.0 }
 0x2a0   :  { %v468_v36 = vadd.f32 %v467_v34, %v466_v32  ;;  %v473_v41 = vsel %vm427_vm11, %v462_v37, 0.0  ;;  %v475_v3 = vsel %vm427_vm11, %v463_v31, 0.0  ;;  %v477_v47 = vsel %vm427_vm11, %v464_v40, 0.0 }
 0x2a1   :  { %v479_v48 = vsel %vm427_vm11, %v465_v44, 0.0 }
 0x2a2   :  { %v470_v33 = vadd.f32 %v469_v38, %v468_v36 }
 0x2a4   :  { %v472_v39 = vadd.f32 %v471_v0, %v470_v33 }
 0x2a6   :  { %v474_v42 = vadd.f32 %v473_v41, %v472_v39 }
 0x2a8   :  { %v476_v46 = vadd.f32 %v475_v3, %v474_v42 }
 0x2aa   :  { %v478_v1 = vadd.f32 %v477_v47, %v476_v46 }
 0x2ac   :  { %v480_v49 = vadd.f32 %v479_v48, %v478_v1 }
 0x2ae   :  { %v481_v50 = vrot.slane %v480_v49, 4 }
 0x2b0   :  { %v482_v51 = vadd.f32 %v481_v50, %v480_v49 }
 0x2b2   :  { %v483_v53 = vrot.slane %v482_v51, 2 }
 0x2b4   :  { %v484_v6 = vadd.f32 %v483_v53, %v482_v51 }
 0x2b6   :  { %v485_v62 = vrot.slane %v484_v6, 1 }
 0x2b8   :  { %v486_v60 = vadd.f32 %v485_v62, %v484_v6 }
 0x2ba   :  { %v487_v5 = vmul.f32 0.015625, %v486_v60 }
 0x2bc   :  { %v488_v54 = vadd.f32 1e-05, %v487_v5 }
 0x2be   :  { %752 = vrsqrt.f32 %v488_v54 }
 0x2c8   :  { %v753_v55 = vpop.eup %752 }
 0x2c9   :  { %v494_v4 = vmul.f32 %v753_v55, %v454_v22  ;;  %v495_v9 = vmul.f32 %v753_v55, %v455_v23  ;;  %v496_v58 = vmul.f32 %v753_v55, %v456_v24  ;;  %v497_v8 = vmul.f32 %v753_v55, %v457_v25 }
 0x2ca   :  { %v490_v61 = vmul.f32 %v753_v55, %v450_v18  ;;  %v491_v10 = vmul.f32 %v753_v55, %v451_v19  ;;  %v492_v11 = vmul.f32 %v753_v55, %v452_v20  ;;  %v493_v12 = vmul.f32 %v753_v55, %v453_v21 }
 0x2cb   :  { %v510_v7 = vmul.f32 %v504_v56, %v494_v4  ;;  %v511_v14 = vmul.f32 %v504_v56, %v495_v9  ;;  %v513_v28 = vmul.f32 %v504_v56, %v497_v8  ;;  %v512_v23 = vmul.f32 %v504_v56, %v496_v58 }
 0x2cc   :  { %v506_v15 = vmul.f32 %v504_v56, %v490_v61  ;;  %v507_v16 = vmul.f32 %v504_v56, %v491_v10  ;;  %v508_v17 = vmul.f32 %v504_v56, %v492_v11  ;;  %v509_v27 = vmul.f32 %v504_v56, %v493_v12 }
 0x2cd   :  { %v522_v29 = vadd.f32 %v515_v13, %v511_v14  ;;  %v521_v24 = vadd.f32 %v515_v13, %v510_v7  ;;  %v524_v21 = vadd.f32 %v515_v13, %v513_v28  ;;  %v523_v37 = vadd.f32 %v515_v13, %v512_v23 }
 0x2ce   :  { %v517_v30 = vadd.f32 %v515_v13, %v506_v15  ;;  %v518_v32 = vadd.f32 %v515_v13, %v507_v16  ;;  %v519_v34 = vadd.f32 %v515_v13, %v508_v17  ;;  %v520_v22 = vadd.f32 %v515_v13, %v509_v27 }
 0x2cf   :  { %v678_v36 = vmul.f32 -1.442695, %v522_v29  ;;  %v677_v38 = vmul.f32 -1.442695, %v521_v24  ;;  %v680_v33 = vmul.f32 -1.442695, %v524_v21 }
 0x2d0   :  { %v673_v25 = vmul.f32 -1.442695, %v517_v30  ;;  %v674_v18 = vmul.f32 -1.442695, %v518_v32  ;;  %v675_v19 = vmul.f32 -1.442695, %v519_v34 }
 0x2d1   :  { %v676_v20 = vmul.f32 -1.442695, %v520_v22  ;;  %v679_v31 = vmul.f32 -1.442695, %v523_v37 }
 0x2d2   :  { %754 = vpow2.f32 %v673_v25 }
 0x2d3   :  { %756 = vpow2.f32 %v674_v18 }
 0x2d4   :  { %758 = vpow2.f32 %v675_v19 }
 0x2d5   :  { %760 = vpow2.f32 %v676_v20 }
 0x2d6   :  { %762 = vpow2.f32 %v678_v36 }
 0x2d7   :  { %764 = vpow2.f32 %v677_v38 }
 0x2d8   :  { %766 = vpow2.f32 %v680_v33 }
 0x2d9   :  { %768 = vpow2.f32 %v679_v31 }
 0x2dc   :  { %v755_v0 = vpop.eup %754 }
 0x2dd   :  { %v757_v39 = vpop.eup %756  ;;  %v549_v40 = vadd.f32 1.0, %v755_v0 }
 0x2de   :  { %v759_v41 = vpop.eup %758  ;;  %v550_v42 = vadd.f32 1.0, %v757_v39 }
 0x2df   :  { %v761_v44 = vpop.eup %760  ;;  %770 = vrcp.f32 %v549_v40  ;;  %v551_v46 = vadd.f32 1.0, %v759_v41 }
 0x2e0   :  { %v763_v3 = vpop.eup %762  ;;  %v552_v47 = vadd.f32 1.0, %v761_v44  ;;  %772 = vrcp.f32 %v550_v42 }
 0x2e1   :  { %v765_v1 = vpop.eup %764  ;;  %v554_v48 = vadd.f32 1.0, %v763_v3 }
 0x2e2   :  { %774 = vrcp.f32 %v552_v47  ;;  %v767_v49 = vpop.eup %766  ;;  %v553_v50 = vadd.f32 1.0, %v765_v1 }
 0x2e3   :  { %776 = vrcp.f32 %v551_v46  ;;  %v769_v51 = vpop.eup %768  ;;  %v556_v53 = vadd.f32 1.0, %v767_v49 }
 0x2e4   :  { %778 = vrcp.f32 %v554_v48  ;;  %v555_v6 = vadd.f32 1.0, %v769_v51 }
 0x2e5   :  { %780 = vrcp.f32 %v553_v50 }
 0x2e6   :  { %782 = vrcp.f32 %v556_v53 }
 0x2e7   :  { %784 = vrcp.f32 %v555_v6 }
 0x2e9   :  { %v771_v62 = vpop.eup %770 }
 0x2ea   :  { %v773_v60 = vpop.eup %772  ;;  %595 = vperm.xlu0 %748, %v771_v62  }
 0x2eb   :  { %600 = vperm.xlu1 %749, %v773_v60  }
 0x2ec   :  { %v775_v5 = vpop.eup %774 }
 0x2ed   :  { %v777_v54 = vpop.eup %776 }
 0x2ee   :  { %610 = vperm.xlu0 %748, %v775_v5   ;;  %v779_v55 = vpop.eup %778 }
 0x2ef   :  { %605 = vperm.xlu1 %749, %v777_v54   ;;  %v781_v56 = vpop.eup %780 }
 0x2f0   :  { %v783_v4 = vpop.eup %782 }
 0x2f1   :  { %v785_v9 = vpop.eup %784 }
 0x2f2   :  { %620 = vperm.xlu0 %748, %v779_v55  }
 0x2f3   :  { %615 = vperm.xlu1 %749, %v781_v56  }
 0x2f6   :  { %630 = vperm.xlu0 %748, %v783_v4  }
 0x2f7   :  { %625 = vperm.xlu1 %749, %v785_v9  }
 0x369   :  { %v596_v58 = vpop.permute.xlu0 %595 }
 0x36a   :  { %v601_v8 = vpop.permute.xlu1 %600  ;;  %v633_v61 = vsel %vm592_vm12, %v596_v58, %v928_v2 }
 0x36b   :  { %v634_v10 = vsel %vm592_vm12, %v601_v8, %v922_v35  ;;  %641 = vst [vmem:[%s1022_s2] sm:$0xff] %v633_v61 }
 0x36c   :  { %642 = vst [vmem:[%s1022_s2 + $0x8] sm:$0xff] %v634_v10 }
 0x36d   :  { %v611_v11 = vpop.permute.xlu0 %610 }
 0x36e   :  { %v606_v12 = vpop.permute.xlu1 %605  ;;  %v636_v13 = vsel %vm592_vm12, %v611_v11, %v933_v43 }
 0x36f   :  { %v635_v2 = vsel %vm592_vm12, %v606_v12, %v939_v45  ;;  %644 = vst [vmem:[%s1022_s2 + $0x18] sm:$0xff] %v636_v13 }
 0x370   :  { %643 = vst [vmem:[%s1022_s2 + $0x10] sm:$0xff] %v635_v2 }
 0x371   :  { %v621_v35 = vpop.permute.xlu0 %620 }
 0x372   :  { %v616_v7 = vpop.permute.xlu1 %615  ;;  %v638_v14 = vsel %vm592_vm12, %v621_v35, %v945_v52 }
 0x373   :  { %v637_v43 = vsel %vm592_vm12, %v616_v7, %v951_v63  ;;  %646 = vst [vmem:[%s1022_s2 + $0x28] sm:$0xff] %v638_v14 }
 0x374   :  { %645 = vst [vmem:[%s1022_s2 + $0x20] sm:$0xff] %v637_v43 }
 0x375   :  { %v631_v45 = vpop.permute.xlu0 %630 }
 0x376   :  { %v626_v15 = vpop.permute.xlu1 %625  ;;  %v640_v16 = vsel %vm592_vm12, %v631_v45, %v957_v57 }
 0x377   :  { %v639_v52 = vsel %vm592_vm12, %v626_v15, %v960_v59  ;;  %648 = vst [vmem:[%s1022_s2 + $0x38] sm:$0xff] %v640_v16 }
 0x378   :  { %647 = vst [vmem:[%s1022_s2 + $0x30] sm:$0xff] %v639_v52 }

</bundles_post_ra>
